<compile_context>
chip_gen: v7x
topology: tpu7x:2x2x1
jax: 0.10.0
libtpu: 0.0.40
codegen_flags: <defaults>
</compile_context>

<pallas_src>
import jax
import jax.numpy as jnp
from jax.experimental import pallas as pl
from jax.experimental.pallas import tpu as pltpu


def _round_up(n, m):
    return ((n + m - 1) // m) * m


def _block_spec(shape, index_map, *, resident=False):
    """BlockSpec; 'resident' operands (constant index_map) get a single buffer."""
    if resident and hasattr(pl, "Buffered"):
        try:
            return pl.BlockSpec(shape, index_map, pipeline_mode=pl.Buffered(1))
        except TypeError:  # older jax without pipeline_mode kwarg
            pass
    return pl.BlockSpec(shape, index_map)


# ---------------------------------------------------------------------------
# Kernel: two MXU matmuls + two bias adds.  BN is already folded into w1/b1.
# Grid = (batch_tiles, classifier_N_tiles); h is computed once per batch tile.
# ---------------------------------------------------------------------------
def classblock_kernel(x_ref, w1_ref, b1_ref, w2_ref, b2_ref, out_ref, h_ref):
    # Bottleneck linear (+ folded BN): only on the first N tile of this batch
    # tile; kept in VMEM scratch and reused for the remaining N tiles.
    @pl.when(pl.program_id(1) == 0)
    def _():
        h = jnp.dot(x_ref[...], w1_ref[...], preferred_element_type=jnp.float32)
        h_ref[...] = (h + b1_ref[...]).astype(h_ref.dtype)

    # Classifier linear for this N tile: [TM, nb_p] @ [nb_p, TN] -> [TM, TN]
    y = jnp.dot(h_ref[...], w2_ref[...], preferred_element_type=jnp.float32)
    out_ref[...] = (y + b2_ref[...]).astype(out_ref.dtype)


# ---------------------------------------------------------------------------
# One-time weight preparation (call ONCE, outside the per-step path):
# BN fold, transpose, zero-pad to MXU-friendly multiples, cast to bf16.
# ---------------------------------------------------------------------------
def prepare_class_block_params(params, eps=1e-5, compute_dtype=jnp.bfloat16,
                               tn_max=1024):
    w1 = params["w1"]          # [num_bottleneck, input_dim]  (PyTorch layout)
    b1 = params["b1"]          # [num_bottleneck]
    gamma = params["bn_gamma"]
    beta = params["bn_beta"]
    run_mean = params["bn_mean"]
    run_var = params["bn_var"]
    w2 = params["w2"]          # [class_num, num_bottleneck]
    b2 = params["b2"]          # [class_num]

    nb, input_dim = w1.shape
    class_num = w2.shape[0]

    # Fold BN (eval) into the first linear:
    #   (x@W1^T + b1)*scale + shift == x@(W1^T*scale) + (b1*scale + shift)
    inv_std = 1.0 / jnp.sqrt(run_var + eps)
    scale = gamma * inv_std
    shift = beta - run_mean * scale
    w1_t = w1.T * scale[None, :]          # [input_dim, nb]
    bias1 = b1 * scale + shift            # [nb]
    w2_t = w2.T                           # [nb, class_num]
    bias2 = b2                            # [class_num]

    # Pad: K dims to 128, MXU N/K of matmuls to 256 (v6e/v7x MXU width).
    in_p = _round_up(input_dim, 128)
    nb_p = _round_up(nb, 256)
    tn = min(tn_max, _round_up(class_num, 256))   # classifier N tile (lane-dense)
    cn_p = _round_up(class_num, tn)               # padded class dim divisible by tn

    w1_p = jnp.zeros((in_p, nb_p), jnp.float32).at[:input_dim, :nb].set(w1_t)
    b1_p = jnp.zeros((1, nb_p), jnp.float32).at[:, :nb].set(bias1)
    w2_p = jnp.zeros((nb_p, cn_p), jnp.float32).at[:nb, :class_num].set(w2_t)
    b2_p = jnp.zeros((1, cn_p), jnp.float32).at[:, :class_num].set(bias2)

    return dict(
        w1=w1_p.astype(compute_dtype),   # bf16 weights for the MXU
        b1=b1_p,                         # biases stay f32 (added to f32 acc)
        w2=w2_p.astype(compute_dtype),
        b2=b2_p,
        input_dim=input_dim,
        num_bottleneck=nb,
        class_num=class_num,
        in_pad=in_p,
        nb_pad=nb_p,
        cn_pad=cn_p,
        tn=tn,
        compute_dtype=compute_dtype,
    )


# ---------------------------------------------------------------------------
# Forward: (batch, classifier-N) grid; w1/b1 VMEM-resident, single-buffered.
# ---------------------------------------------------------------------------
def class_block_forward(x, prep, *, tm=256, out_dtype=jnp.float32):
    """x: [B, input_dim].  prep: output of prepare_class_block_params."""
    B, input_dim = x.shape
    assert input_dim == prep["input_dim"]
    in_p = prep["in_pad"]
    nb_p = prep["nb_pad"]
    cn_p = prep["cn_pad"]
    tn = prep["tn"]
    cdt = prep["compute_dtype"]
    nb = prep["num_bottleneck"]
    class_num = prep["class_num"]

    # ---- batch tile selection --------------------------------------------
    tm = min(tm, _round_up(B, 16))            # bf16 vreg = 16 sublanes
    if B >= 32 and _round_up(B, tm) // tm < 2:
        # >= 2 batch grid steps so the "parallel" axis shards across v7x's 2 TCs.
        tm = _round_up(-(-B // 2), 16)
    b_pad = _round_up(B, tm)

    # ---- input: cast once; pad only if unaligned (no unconditional copy) ---
    x_c = x.astype(cdt)
    pad_b, pad_in = b_pad - B, in_p - input_dim
    if pad_b or pad_in:
        x_c = jnp.pad(x_c, ((0, pad_b), (0, pad_in)))

    n_tiles = cn_p // tn
    grid = (b_pad // tm, n_tiles)
    out_bytes = jnp.dtype(out_dtype).itemsize

    # ---- VMEM budget (resident weights single-buffered) -------------------
    w2_bufs = 1 if n_tiles == 1 else 2
    vmem_need = (
        in_p * nb_p * 2 + nb_p * 4                    # w1 + b1 (single buffer)
        + (nb_p * tn * 2 + tn * 4) * w2_bufs          # w2 + b2 tiles
        + tm * in_p * 2 * 2                           # x tile, double-buffered
        + tm * tn * out_bytes * 2                     # out tile, double-buffered
        + tm * nb_p * 2                               # h scratch
    )
    vmem_limit = int(min(64 * 2**20, max(2 * vmem_need + (2 << 20), 16 * 2**20)))

    cost = pl.CostEstimate(
        flops=2 * B * (input_dim * nb + nb * class_num),
        transcendentals=0,
        bytes_accessed=(B * input_dim * 2 + in_p * nb_p * 2 + nb_p * cn_p * 2
                        + B * cn_p * out_bytes),
    )

    out = pl.pallas_call(
        classblock_kernel,
        out_shape=jax.ShapeDtypeStruct((b_pad, cn_p), out_dtype),
        grid=grid,
        in_specs=[
            _block_spec((tm, in_p), lambda i, j: (i, 0)),                   # x
            _block_spec((in_p, nb_p), lambda i, j: (0, 0), resident=True),  # w1
            _block_spec((1, nb_p), lambda i, j: (0, 0), resident=True),     # b1
            _block_spec((nb_p, tn), lambda i, j: (0, j),
                        resident=(n_tiles == 1)),                           # w2
            _block_spec((1, tn), lambda i, j: (0, j),
                        resident=(n_tiles == 1)),                           # b2
        ],
        out_specs=pl.BlockSpec((tm, tn), lambda i, j: (i, j)),
        scratch_shapes=[pltpu.VMEM((tm, nb_p), cdt)],                       # h
        compiler_params=pltpu.CompilerParams(
            dimension_semantics=("parallel", "arbitrary"),
            vmem_limit_bytes=vmem_limit),
        cost_estimate=cost,
    )(x_c, prep["w1"], prep["b1"], prep["w2"], prep["b2"])

    return out[:B, :class_num]


# ---------------------------------------------------------------------------
# Param init matching weights_init_kaiming / weights_init_classifier.
# ---------------------------------------------------------------------------
def init_class_block_params(key, input_dim, num_bottleneck, class_num):
    k1, k2, k3 = jax.random.split(key, 3)
    # nn.Linear(input_dim, num_bottleneck): kaiming_normal mode='fan_out'
    #   -> std = sqrt(2 / num_bottleneck); bias = 0
    w1 = jax.random.normal(k1, (num_bottleneck, input_dim), jnp.float32) \
        * jnp.sqrt(2.0 / num_bottleneck)
    b1 = jnp.zeros((num_bottleneck,), jnp.float32)
    # BatchNorm1d: weight ~ N(1, 0.02), bias = 0, fresh running stats (0, 1)
    bn_gamma = 1.0 + 0.02 * jax.random.normal(k2, (num_bottleneck,), jnp.float32)
    bn_beta = jnp.zeros((num_bottleneck,), jnp.float32)
    bn_mean = jnp.zeros((num_bottleneck,), jnp.float32)
    bn_var = jnp.ones((num_bottleneck,), jnp.float32)
    # classifier nn.Linear(num_bottleneck, class_num): N(0, 0.001), bias = 0
    w2 = 0.001 * jax.random.normal(k3, (class_num, num_bottleneck), jnp.float32)
    b2 = jnp.zeros((class_num,), jnp.float32)
    return dict(w1=w1, b1=b1, bn_gamma=bn_gamma, bn_beta=bn_beta,
                bn_mean=bn_mean, bn_var=bn_var, w2=w2, b2=b2)


def class_block_ref(x, params, eps=1e-5):
    """Pure-JAX f32 reference of the same inference forward."""
    h = x @ params["w1"].T + params["b1"]
    h = (h - params["bn_mean"]) / jnp.sqrt(params["bn_var"] + eps)
    h = h * params["bn_gamma"] + params["bn_beta"]
    return h @ params["w2"].T + params["b2"]


if __name__ == "__main__":
    B = 8
    INPUT_DIM = 64
    NUM_BOTTLENECK = 128
    CLASS_NUM = 16

    key = jax.random.PRNGKey(0)
    kx, kp = jax.random.split(key)
    x = jax.random.normal(kx, (B, INPUT_DIM), jnp.float32)
    params = init_class_block_params(kp, INPUT_DIM, NUM_BOTTLENECK, CLASS_NUM)

    # One-time weight prep (BN fold + transpose + pad + bf16 cast).
    prep = prepare_class_block_params(params)

    out = class_block_forward(x, prep)
    out = jax.block_until_ready(out)

    ref = class_block_ref(x, params)
    assert out.shape == (B, CLASS_NUM)
    # bf16 MXU inputs with f32 accumulation: loosen tolerance vs the f32 ref.
    assert jnp.allclose(out, ref, atol=5e-3, rtol=5e-2), \
        float(jnp.max(jnp.abs(out - ref)))

    print("KERNEL_OK")
</pallas_src>

<mosaic_0001>
module attributes {stable_mosaic.version = 11 : i64} {
  func.func @classblock_kernel(%arg0: i32, %arg1: i32, %arg2: memref<16x128xbf16, #tpu.memory_space<vmem>>, %arg3: memref<128x256xbf16, #tpu.memory_space<vmem>>, %arg4: memref<1x256xf32, #tpu.memory_space<vmem>>, %arg5: memref<256x256xbf16, #tpu.memory_space<vmem>>, %arg6: memref<1x256xf32, #tpu.memory_space<vmem>>, %arg7: memref<16x256xf32, #tpu.memory_space<vmem>>, %arg8: memref<16x256xbf16, #tpu.memory_space<vmem>>) attributes {dimension_semantics = [#tpu.dimension_semantics<parallel>, #tpu.dimension_semantics<arbitrary>], iteration_bounds = array<i64: 1, 1>, scalar_prefetch = 0 : i64, scratch_operands = 1 : i64, tpu.core_type = #tpu.core_type<tc>, window_params = [{transform_indices = @transform_0, window_bounds = array<i64: 16, 128>}, {pipeline_mode = #tpu.pipeline_mode<synchronous>, transform_indices = @transform_1, window_bounds = array<i64: 128, 256>}, {pipeline_mode = #tpu.pipeline_mode<synchronous>, transform_indices = @transform_2, window_bounds = array<i64: 1, 256>}, {pipeline_mode = #tpu.pipeline_mode<synchronous>, transform_indices = @transform_3, window_bounds = array<i64: 256, 256>}, {pipeline_mode = #tpu.pipeline_mode<synchronous>, transform_indices = @transform_4, window_bounds = array<i64: 1, 256>}, {transform_indices = @transform_5, window_bounds = array<i64: 16, 256>}]} {
    %c0_i32 = arith.constant 0 : i32
    %0 = arith.cmpi eq, %arg1, %c0_i32 : i32
    %1 = arith.extui %0 : i1 to i32
    %c0_i32_0 = arith.constant 0 : i32
    %2 = arith.cmpi ne, %1, %c0_i32_0 : i32
    scf.if %2 {
      %c0_8 = arith.constant 0 : index
      %c0_9 = arith.constant 0 : index
      %10 = vector.load %arg2[%c0_8, %c0_9] : memref<16x128xbf16, #tpu.memory_space<vmem>>, vector<16x128xbf16>
      %c0_10 = arith.constant 0 : index
      %c0_11 = arith.constant 0 : index
      %11 = vector.load %arg3[%c0_10, %c0_11] : memref<128x256xbf16, #tpu.memory_space<vmem>>, vector<128x256xbf16>
      %cst_12 = arith.constant dense<0.000000e+00> : vector<16x256xf32>
      %12 = tpu.matmul %10, %11, %cst_12 {dimension_numbers = #tpu.dot_dimension_numbers<[1], [0], [0], [1], [0, 0, 1, 1], [], []>} : vector<16x128xbf16>, vector<128x256xbf16>, vector<16x256xf32> -> vector<16x256xf32>
      %c0_13 = arith.constant 0 : index
      %c0_14 = arith.constant 0 : index
      %13 = vector.load %arg4[%c0_13, %c0_14] : memref<1x256xf32, #tpu.memory_space<vmem>>, vector<1x256xf32>
      %14 = vector.broadcast %13 : vector<1x256xf32> to vector<16x256xf32>
      %15 = arith.addf %12, %14 : vector<16x256xf32>
      %16 = arith.truncf %15 : vector<16x256xf32> to vector<16x256xbf16>
      %c0_15 = arith.constant 0 : index
      %c0_16 = arith.constant 0 : index
      %17 = vector.load %arg8[%c0_15, %c0_16] : memref<16x256xbf16, #tpu.memory_space<vmem>>, vector<16x256xbf16>
      tpu.vector_store %arg8[%c0_15, %c0_16], %16 {strides = array<i32>} : memref<16x256xbf16, #tpu.memory_space<vmem>>, vector<16x256xbf16>,
    } else {
    }
    %c0 = arith.constant 0 : index
    %c0_1 = arith.constant 0 : index
    %3 = vector.load %arg8[%c0, %c0_1] : memref<16x256xbf16, #tpu.memory_space<vmem>>, vector<16x256xbf16>
    %c0_2 = arith.constant 0 : index
    %c0_3 = arith.constant 0 : index
    %4 = vector.load %arg5[%c0_2, %c0_3] : memref<256x256xbf16, #tpu.memory_space<vmem>>, vector<256x256xbf16>
    %cst = arith.constant dense<0.000000e+00> : vector<16x256xf32>
    %5 = tpu.matmul %3, %4, %cst {dimension_numbers = #tpu.dot_dimension_numbers<[1], [0], [0], [1], [0, 0, 1, 1], [], []>} : vector<16x256xbf16>, vector<256x256xbf16>, vector<16x256xf32> -> vector<16x256xf32>
    %c0_4 = arith.constant 0 : index
    %c0_5 = arith.constant 0 : index
    %6 = vector.load %arg6[%c0_4, %c0_5] : memref<1x256xf32, #tpu.memory_space<vmem>>, vector<1x256xf32>
    %7 = vector.broadcast %6 : vector<1x256xf32> to vector<16x256xf32>
    %8 = arith.addf %5, %7 : vector<16x256xf32>
    %c0_6 = arith.constant 0 : index
    %c0_7 = arith.constant 0 : index
    %9 = vector.load %arg7[%c0_6, %c0_7] : memref<16x256xf32, #tpu.memory_space<vmem>>, vector<16x256xf32>
    tpu.vector_store %arg7[%c0_6, %c0_7], %8 {strides = array<i32>} : memref<16x256xf32, #tpu.memory_space<vmem>>, vector<16x256xf32>,
    return
  }
  func.func @transform_0(%arg0: i32, %arg1: i32) -> (i32, i32) {
    %c0_i32 = arith.constant 0 : i32
    %c0_i32_0 = arith.constant 0 : i32
    return %arg0, %c0_i32 : i32, i32
  }
  func.func @transform_1(%arg0: i32, %arg1: i32) -> (i32, i32) {
    %c0_i32 = arith.constant 0 : i32
    %c0_i32_0 = arith.constant 0 : i32
    %c0_i32_1 = arith.constant 0 : i32
    return %c0_i32, %c0_i32_0 : i32, i32
  }
  func.func @transform_2(%arg0: i32, %arg1: i32) -> (i32, i32) {
    %c0_i32 = arith.constant 0 : i32
    %c0_i32_0 = arith.constant 0 : i32
    %c0_i32_1 = arith.constant 0 : i32
    return %c0_i32, %c0_i32_0 : i32, i32
  }
  func.func @transform_3(%arg0: i32, %arg1: i32) -> (i32, i32) {
    %c0_i32 = arith.constant 0 : i32
    %c0_i32_0 = arith.constant 0 : i32
    return %c0_i32, %arg1 : i32, i32
  }
  func.func @transform_4(%arg0: i32, %arg1: i32) -> (i32, i32) {
    %c0_i32 = arith.constant 0 : i32
    %c0_i32_0 = arith.constant 0 : i32
    return %c0_i32, %arg1 : i32, i32
  }
  func.func @transform_5(%arg0: i32, %arg1: i32) -> (i32, i32) {
    %c0_i32 = arith.constant 0 : i32
    return %arg0, %arg1 : i32, i32
  }
}

</mosaic_0001>

<bundles_post_ra>
// kernel: tpu_custom_call.1
= control target key start
LH: loop header
LB: loop body
LE: loop exit
PB: predicated region body
PF: predicated region fallthrough
CT: control target
= control target key end

     0   :  { %10 = vsyncpa [#allocation4], 0  ;;  %s829_s0 = inlined_call_operand.hbm [shape: bf16[16,128], index: 0, kind: input, shape index: {}]   ;;  %s830_s1 = inlined_call_operand.hbm [shape: bf16[128,256], index: 1, kind: input, shape index: {}]   ;;  %s831_s2 = inlined_call_operand.vmem [shape: f32[1,256], index: 2, kind: input, shape index: {}]   ;;  %s832_s3 = inlined_call_operand.hbm [shape: bf16[256,256], index: 3, kind: input, shape index: {}]   ;;  %s833_s4 = inlined_call_operand.vmem [shape: f32[1,256], index: 4, kind: input, shape index: {}]   ;;  %s834_s5 = inlined_call_operand.hbm [shape: f32[16,256], index: 5, kind: output, shape index: {}]  }
   0x1   :  { %11 = vsyncpa [#allocation7], 0 }
   0x2   :  { %12 = vsyncpa [#allocation5], 0  ;;  %s728_s18 = smov [#allocation6]   ;;  %s634_s22 = scalar_lea.hbm %s830_s1, 2048 }
   0x3   :  { %s30_s19 = sshll.u32 %s728_s18, 4  ;;  %p635_p0 = scmp.ne.s32.totalorder %s830_s1, %s634_s22  ;;  %s31_s19 = int_to_ptr.vmem [resolvable:$true] %s30_s19 }
   0x4   :  { %p638_p1 = scmp.lt.u32.totalorder %s634_s22, %s830_s1 }
   0x6   :  { %p640_p2 = pnand %p638_p1, %p635_p0 }
   0x8   :  { %643 = shalt.err (!%p640_p2)
}
   0x9   :  { %s644_s27 = scalar_lea.vmem %s31_s19, 2048  ;;  %p649_p4 = scmp.lt.s32.totalorder %s31_s19, %s31_s19 }
   0xa   :  { %p645_p3 = scmp.ne.s32.totalorder %s31_s19, %s644_s27  ;;  %p650_p5 = scmp.lt.s32.totalorder %s644_s27, %s644_s27 }
   0xc   :  { %p651_p6 = por %p650_p5, %p649_p4 }
   0xe   :  { %p652_p7 = pnand %p651_p6, %p645_p3 }
  0x10   :  { %655 = shalt.err (!%p652_p7)
}
  0x11   :  { %s729_s28 = smov 128   ;;  %s730_s29 = smov 8  }
  0x12   :  { %36 = dma.hbm_to_vmem [thread:$0]  %s830_s1, 2048, %s31_s19, [#allocation7], %s729_s28, %s729_s28, %s730_s29  }
  0x13   :  { %s731_s7 = smov [#allocation3]   ;;  %s656_s11 = scalar_lea.hbm %s829_s0, 128 }
  0x14   :  { %s18_s8 = sshll.u32 %s731_s7, 4  ;;  %p657_p8 = scmp.ne.s32.totalorder %s829_s0, %s656_s11  ;;  %s19_s8 = int_to_ptr.vmem [resolvable:$true] %s18_s8 }
  0x15   :  { %p660_p9 = scmp.lt.u32.totalorder %s656_s11, %s829_s0 }
  0x17   :  { %p662_p10 = pnand %p660_p9, %p657_p8 }
  0x19   :  { %665 = shalt.err (!%p662_p10)
}
  0x1a   :  { %s666_s16 = scalar_lea.vmem %s19_s8, 128  ;;  %p671_p12 = scmp.lt.s32.totalorder %s19_s8, %s19_s8 }
  0x1b   :  { %p667_p11 = scmp.ne.s32.totalorder %s19_s8, %s666_s16  ;;  %p672_p13 = scmp.lt.s32.totalorder %s666_s16, %s666_s16 }
  0x1d   :  { %p673_p0 = por %p672_p13, %p671_p12 }
  0x1f   :  { %p674_p1 = pnand %p673_p0, %p667_p11 }
  0x21   :  { %677 = shalt.err (!%p674_p1)
}
  0x22   :  { %s732_s1 = smov 64   ;;  %s733_s17 = smov 4  }
  0x23   :  { %24 = dma.hbm_to_vmem [thread:$0]  %s829_s0, 128, %s19_s8, [#allocation4], %s732_s1, %s732_s1, %s733_s17  }
  0x24   :  { %s734_s20 = smov [#allocation8]   ;;  %s678_s24 = scalar_lea.hbm %s832_s3, 4096 }
  0x25   :  { %s44_s21 = sshll.u32 %s734_s20, 4  ;;  %p679_p2 = scmp.ne.s32.totalorder %s832_s3, %s678_s24  ;;  %s45_s21 = int_to_ptr.vmem [resolvable:$true] %s44_s21 }
  0x26   :  { %p682_p3 = scmp.lt.u32.totalorder %s678_s24, %s832_s3 }
  0x28   :  { %p684_p4 = pnand %p682_p3, %p679_p2 }
  0x2a   :  { %687 = shalt.err (!%p684_p4)
}
  0x2b   :  { %s688_s6 = scalar_lea.vmem %s45_s21, 4096  ;;  %p693_p6 = scmp.lt.s32.totalorder %s45_s21, %s45_s21 }
  0x2c   :  { %p689_p5 = scmp.ne.s32.totalorder %s45_s21, %s688_s6  ;;  %p694_p7 = scmp.lt.s32.totalorder %s688_s6, %s688_s6 }
  0x2e   :  { %p695_p8 = por %p694_p7, %p693_p6 }
  0x30   :  { %p696_p9 = pnand %p695_p8, %p689_p5 }
  0x32   :  { %699 = shalt.err (!%p696_p9)
}
  0x33   :  { %50 = dma.hbm_to_vmem [thread:$0]  %s832_s3, 4096, %s45_s21, [#allocation7], %s729_s28, %s729_s28, %s730_s29  }
  0x34   :  { %722 = dma.done.wait [#allocation4], 128  }
  0x35   :  { %723 = vsyncadd [#allocation4], 4294967168 }
  0x36   :  { %724 = dma.done.wait [#allocation7], 6144  }
  0x37   :  { %725 = vsyncadd [#allocation7], 4294961152  ;;  %v735_v0 = vmov 0   ;;  %v561_v1 = vld [vmem:[#allocation6 + $0x4] ss:$8 sps:$4 sm:$0xff]   ;;  %v585_v28 = vld [vmem:[#allocation3] sm:$0xff]   ;;  %v87_v50 = vlaneseq }
  0x38   :  { %215 = vmatprep.mubr.bf16.mxu0 %v735_v0  ;;  %v563_v2 = vld [vmem:[#allocation6] ss:$8 sps:$4 sm:$0xff]   ;;  %183 = vmatprep.subr.bf16.mxu0 %v561_v1  ;;  %v564_v3 = vld [vmem:[#allocation6 + $0x14] ss:$8 sps:$4 sm:$0xff]   ;;  %v566_v4 = vld [vmem:[#allocation6 + $0x10] ss:$8 sps:$4 sm:$0xff]  }
  0x39   :  { %184 = vmatpush1.bf16.msra.mxu0 %v563_v2  ;;  %v567_v5 = vld [vmem:[#allocation6 + $0x24] ss:$8 sps:$4 sm:$0xff]   ;;  %v569_v6 = vld [vmem:[#allocation6 + $0x20] ss:$8 sps:$4 sm:$0xff]   ;;  %v570_v7 = vld [vmem:[#allocation6 + $0x34] ss:$8 sps:$4 sm:$0xff]  }
  0x3a   :  { %185 = vmatprep.subr.bf16.mxu0 %v564_v3  ;;  %v572_v8 = vld [vmem:[#allocation6 + $0x30] ss:$8 sps:$4 sm:$0xff]   ;;  %v573_v9 = vld [vmem:[#allocation6 + $0x44] ss:$8 sps:$4 sm:$0xff]   ;;  %v588_v11 = vld [vmem:[#allocation8] ss:$8 sps:$4 sm:$0xff]  }
  0x3b   :  { %v586_v10 = vld [vmem:[#allocation8 + $0x4] ss:$8 sps:$4 sm:$0xff]   ;;  %v589_v12 = vld [vmem:[#allocation8 + $0x14] ss:$8 sps:$4 sm:$0xff]   ;;  %v575_v13 = vld [vmem:[#allocation6 + $0x40] ss:$8 sps:$4 sm:$0xff]  }
  0x3c   :  { %436 = vmatprep.subr.bf16.mxu1 %v586_v10  ;;  %v591_v14 = vld [vmem:[#allocation8 + $0x10] ss:$8 sps:$4 sm:$0xff]   ;;  %v576_v15 = vld [vmem:[#allocation6 + $0x54] ss:$8 sps:$4 sm:$0xff]   ;;  %v592_v16 = vld [vmem:[#allocation8 + $0x24] ss:$8 sps:$4 sm:$0xff]  }
  0x3d   :  { %186 = vmatpush1.bf16.msra.mxu0 %v566_v4  ;;  %437 = vmatpush1.bf16.msra.mxu1 %v588_v11  ;;  %v578_v17 = vld [vmem:[#allocation6 + $0x50] ss:$8 sps:$4 sm:$0xff]   ;;  %v594_v18 = vld [vmem:[#allocation8 + $0x20] ss:$8 sps:$4 sm:$0xff]   ;;  %v579_v19 = vld [vmem:[#allocation6 + $0x64] ss:$8 sps:$4 sm:$0xff]  }
  0x3e   :  { %187 = vmatprep.subr.bf16.mxu0 %v567_v5  ;;  %438 = vmatprep.subr.bf16.mxu1 %v589_v12  ;;  %v595_v20 = vld [vmem:[#allocation8 + $0x34] ss:$8 sps:$4 sm:$0xff]   ;;  %v581_v21 = vld [vmem:[#allocation6 + $0x60] ss:$8 sps:$4 sm:$0xff]   ;;  %v597_v22 = vld [vmem:[#allocation8 + $0x30] ss:$8 sps:$4 sm:$0xff]  }
  0x3f   :  { %v582_v23 = vld [vmem:[#allocation6 + $0x74] ss:$8 sps:$4 sm:$0xff]   ;;  %v598_v24 = vld [vmem:[#allocation8 + $0x44] ss:$8 sps:$4 sm:$0xff]   ;;  %v584_v25 = vld [vmem:[#allocation6 + $0x70] ss:$8 sps:$4 sm:$0xff]  }
  0x40   :  { %v600_v26 = vld [vmem:[#allocation8 + $0x40] ss:$8 sps:$4 sm:$0xff]   ;;  %v601_v27 = vld [vmem:[#allocation8 + $0x54] ss:$8 sps:$4 sm:$0xff]   ;;  %v603_v29 = vld [vmem:[#allocation8 + $0x50] ss:$8 sps:$4 sm:$0xff]  }
  0x41   :  { %188 = vmatpush1.bf16.msra.mxu0 %v569_v6  ;;  %439 = vmatpush1.bf16.msra.mxu1 %v591_v14  ;;  %v604_v30 = vld [vmem:[#allocation8 + $0x64] ss:$8 sps:$4 sm:$0xff]   ;;  %v606_v31 = vld [vmem:[#allocation8 + $0x60] ss:$8 sps:$4 sm:$0xff]   ;;  %v607_v32 = vld [vmem:[#allocation8 + $0x74] ss:$8 sps:$4 sm:$0xff]  }
  0x42   :  { %189 = vmatprep.subr.bf16.mxu0 %v570_v7  ;;  %440 = vmatprep.subr.bf16.mxu1 %v592_v16  ;;  %v609_v33 = vld [vmem:[#allocation8 + $0x70] ss:$8 sps:$4 sm:$0xff]   ;;  %v610_v34 = vld [vmem:[#allocation8 + $0x84] ss:$8 sps:$4 sm:$0xff]   ;;  %v612_v35 = vld [vmem:[#allocation8 + $0x80] ss:$8 sps:$4 sm:$0xff]  }
  0x43   :  { %v613_v36 = vld [vmem:[#allocation8 + $0x94] ss:$8 sps:$4 sm:$0xff]   ;;  %v615_v37 = vld [vmem:[#allocation8 + $0x90] ss:$8 sps:$4 sm:$0xff]   ;;  %v616_v38 = vld [vmem:[#allocation8 + $0xa4] ss:$8 sps:$4 sm:$0xff]  }
  0x44   :  { %v618_v39 = vld [vmem:[#allocation8 + $0xa0] ss:$8 sps:$4 sm:$0xff]   ;;  %v619_v40 = vld [vmem:[#allocation8 + $0xb4] ss:$8 sps:$4 sm:$0xff]   ;;  %v621_v41 = vld [vmem:[#allocation8 + $0xb0] ss:$8 sps:$4 sm:$0xff]  }
  0x45   :  { %190 = vmatpush1.bf16.msra.mxu0 %v572_v8  ;;  %441 = vmatpush1.bf16.msra.mxu1 %v594_v18  ;;  %v622_v42 = vld [vmem:[#allocation8 + $0xc4] ss:$8 sps:$4 sm:$0xff]   ;;  %v624_v43 = vld [vmem:[#allocation8 + $0xc0] ss:$8 sps:$4 sm:$0xff]   ;;  %v625_v44 = vld [vmem:[#allocation8 + $0xd4] ss:$8 sps:$4 sm:$0xff]  }
  0x46   :  { %191 = vmatprep.subr.bf16.mxu0 %v573_v9  ;;  %442 = vmatprep.subr.bf16.mxu1 %v595_v20  ;;  %v627_v45 = vld [vmem:[#allocation8 + $0xd0] ss:$8 sps:$4 sm:$0xff]   ;;  %v628_v46 = vld [vmem:[#allocation8 + $0xe4] ss:$8 sps:$4 sm:$0xff]   ;;  %v630_v47 = vld [vmem:[#allocation8 + $0xe0] ss:$8 sps:$4 sm:$0xff]  }
  0x47   :  { %v631_v48 = vld [vmem:[#allocation8 + $0xf4] ss:$8 sps:$4 sm:$0xff]   ;;  %v633_v49 = vld [vmem:[#allocation8 + $0xf0] ss:$8 sps:$4 sm:$0xff]   ;;  %v88_v51 = vshrl.u32 %v87_v50, 7 }
  0x48   :  { %v85_v53 = vld [vmem:[%s831_s2] sm:$0x3]  ;;  %s736_s2 = smov [#allocation9]  }
  0x49   :  { %192 = vmatpush1.bf16.msra.mxu0 %v575_v13  ;;  %443 = vmatpush1.bf16.msra.mxu1 %v597_v22  ;;  %v89_v52 = vsub.s32 0, %v88_v51  ;;  %v93_v54 = vsub.s32 1, %v88_v51  ;;  %v264_v3 = vld [vmem:[%s833_s4] sm:$0x3]  ;;  %s488_s9 = sshll.u32 %s736_s2, 4  ;;  %s489_s9 = int_to_ptr.vmem [resolvable:$true] %s488_s9 }
  0x4a   :  { %193 = vmatprep.subr.bf16.mxu0 %v576_v15  ;;  %444 = vmatprep.subr.bf16.mxu1 %v598_v24  ;;  %s700_s10 = scalar_lea.vmem %s489_s9, 512  ;;  %p705_p11 = scmp.lt.s32.totalorder %s489_s9, %s489_s9 }
  0x4b   :  { %v90_v55 = vrot.slane %v85_v53, %v89_v52  ;;  %v94_v57 = vrot.slane %v85_v53, %v93_v54  ;;  %v269_v4 = vrot.slane %v264_v3, %v89_v52  ;;  %v273_v5 = vrot.slane %v264_v3, %v93_v54  ;;  %p701_p10 = scmp.ne.s32.totalorder %s489_s9, %s700_s10  ;;  %p706_p12 = scmp.lt.s32.totalorder %s700_s10, %s700_s10 }
  0x4d   :  { %194 = vmatpush1.bf16.msra.mxu0 %v578_v17  ;;  %445 = vmatpush1.bf16.msra.mxu1 %v600_v26  ;;  %p707_p13 = por %p706_p12, %p705_p11 }
  0x4e   :  { %195 = vmatprep.subr.bf16.mxu0 %v579_v19  ;;  %446 = vmatprep.subr.bf16.mxu1 %v601_v27 }
  0x4f   :  { %p708_p0 = pnand %p707_p13, %p701_p10 }
  0x51   :  { %196 = vmatpush1.bf16.msra.mxu0 %v581_v21  ;;  %447 = vmatpush1.bf16.msra.mxu1 %v603_v29 }
  0x52   :  { %197 = vmatprep.subr.bf16.mxu0 %v582_v23  ;;  %448 = vmatprep.subr.bf16.mxu1 %v604_v30 }
  0x55   :  { %198 = vmatpush1.bf16.msra.mxu0 %v584_v25  ;;  %449 = vmatpush1.bf16.msra.mxu1 %v606_v31 }
  0x56   :  { %450 = vmatprep.subr.bf16.mxu1 %v607_v32 }
  0x58   :  { %216 = vmatmul.mubr.bf16.vlgmr.msra.gmra.mrb[0].mxu0 %v585_v28 }
  0x59   :  { %451 = vmatpush1.bf16.msra.mxu1 %v609_v33 }
  0x5a   :  { %452 = vmatprep.subr.bf16.mxu1 %v610_v34 }
  0x5d   :  { %453 = vmatpush1.bf16.msra.mxu1 %v612_v35 }
  0x5e   :  { %454 = vmatprep.subr.bf16.mxu1 %v613_v36 }
  0x61   :  { %455 = vmatpush1.bf16.msra.mxu1 %v615_v37 }
  0x62   :  { %456 = vmatprep.subr.bf16.mxu1 %v616_v38 }
  0x65   :  { %457 = vmatpush1.bf16.msra.mxu1 %v618_v39 }
  0x66   :  { %458 = vmatprep.subr.bf16.mxu1 %v619_v40 }
  0x69   :  { %459 = vmatpush1.bf16.msra.mxu1 %v621_v41 }
  0x6a   :  { %460 = vmatprep.subr.bf16.mxu1 %v622_v42 }
  0x6d   :  { %461 = vmatpush1.bf16.msra.mxu1 %v624_v43 }
  0x6e   :  { %462 = vmatprep.subr.bf16.mxu1 %v625_v44 }
  0x71   :  { %463 = vmatpush1.bf16.msra.mxu1 %v627_v45 }
  0x72   :  { %464 = vmatprep.subr.bf16.mxu1 %v628_v46 }
  0x75   :  { %465 = vmatpush1.bf16.msra.mxu1 %v630_v47 }
  0x76   :  { %466 = vmatprep.subr.bf16.mxu1 %v631_v48 }
  0x79   :  { %467 = vmatpush1.bf16.msra.mxu1 %v633_v49 }
 0x12b   :  { %v217_v56 = vpop.f32.mrb[0].mxu0 }
 0x12c   :  { %v219_v58 = vpop.f32.mrb[1].mxu0  ;;  %v218_v60 = vadd.f32 %v217_v56, %v90_v55 }
 0x12d   :  { %v221_v59 = vpop.f32.mrb[2].mxu0  ;;  %v220_v63 = vadd.f32 %v219_v58, %v94_v57 }
 0x12e   :  { %v222_v61 = vadd.f32 %v221_v59, %v90_v55  ;;  %v223_v62 = vpop.f32.mrb[3].mxu0 }
 0x12f   :  { %v224_v0 = vadd.f32 %v223_v62, %v94_v57 }
 0x130   :  { %v226_v1 = vpack.c.bf16 %v222_v61, %v218_v60 }
 0x131   :  { %v227_v2 = vpack.c.bf16 %v224_v0, %v220_v63 }
 0x133   :  { %468 = vmatprep.mubr.bf16.mxu1 %v227_v2 }
 0x134   :  { %469 = vmatmul.mubr.bf16.vlgmr.msra.gmra.mrb[0].mxu1 %v226_v1 }
 0x207   :  { %v470_v6 = vpop.f32.mrb[0].mxu1 }
 0x208   :  { %v471_v7 = vadd.f32 %v470_v6, %v269_v4  ;;  %v472_v8 = vpop.f32.mrb[1].mxu1 }
 0x209   :  { %v473_v9 = vadd.f32 %v472_v8, %v273_v5  ;;  %v474_v10 = vpop.f32.mrb[2].mxu1 }
 0x20a   :  { %479 = vst [vmem:[#allocation9] sm:$0xff] %v471_v7  ;;  %v475_v11 = vadd.f32 %v474_v10, %v269_v4  ;;  %v476_v12 = vpop.f32.mrb[3].mxu1 }
 0x20b   :  { %480 = vst [vmem:[#allocation9 + $0x8] sm:$0xff] %v473_v9  ;;  %v477_v13 = vadd.f32 %v476_v12, %v273_v5 }
 0x20c   :  { %481 = vst [vmem:[#allocation9 + $0x10] sm:$0xff] %v475_v11 }
 0x20d   :  { %482 = vst [vmem:[#allocation9 + $0x18] sm:$0xff] %v477_v13 }
 0x20e   :  { %711 = shalt.err (!%p708_p0)
}
 0x20f   :  { %s712_s12 = scalar_lea.hbm %s834_s5, 512 }
 0x210   :  { %p713_p1 = scmp.ne.s32.totalorder %s834_s5, %s712_s12  ;;  %p716_p2 = scmp.lt.u32.totalorder %s712_s12, %s834_s5 }
 0x212   :  { %p718_p3 = pnand %p716_p2, %p713_p1 }
 0x214   :  { %721 = shalt.err (!%p718_p3)
}
 0x215   :  { %s737_s1 = smov 256   ;;  %s738_s17 = smov 16  }
 0x216   :  { %494 = dma.vmem_to_hbm [thread:$0]  %s489_s9, 512, %s834_s5, [#allocation5], %s737_s1, %s737_s1, %s738_s17  }
 0x217   :  { %726 = dma.done.wait [#allocation5], 512  }
 0x218   :  { %727 = vsyncadd [#allocation5], 4294966784 }
 0x219   :  { %498 = vsyncpa [#allocation4], 1 }
 0x21a   :  { %499 = vsyncpa [#allocation7], 1 }
 0x21b   :  { %500 = vsyncpa [#allocation5], 1 }

</bundles_post_ra>
